<compile_context>
chip_gen: v7x
topology: tpu7x:2x2x1
jax: 0.10.0
libtpu: 0.0.40
codegen_flags: <defaults>
</compile_context>

<pallas_src>
import functools
import math

import jax
import jax.numpy as jnp
from jax import lax
from jax.experimental import pallas as pl
from jax.experimental.pallas import tpu as pltpu

BN_EPS = 1e-5
_TILE_BUDGET_BYTES = 12 << 20    # per-tile working-set target (incl. double buffers)
_VMEM_LIMIT_BYTES = 32 << 20     # explicit scoped-VMEM limit (safe on v5e/v6e/v7x)


def _round_up(a, m):
    return (a + m - 1) // m * m


def _conv_tile(x_ref, w_ref, kernel_size):
    """Conv1d on one lane-dense tile.

    x_ref: (C_in, TM) tile whose flat columns are whole, halo-free segments.
    w_ref: (K, C_out, C_in) weight taps.
    Tap j is x shifted left by j, built with pltpu.roll; the wrap-around only lands in
    columns that pass 1 masks out and the wrapper discards.  Returns (C_out, TM) f32.
    """
    x = x_ref[...]
    tm = x.shape[-1]
    acc = jnp.dot(w_ref[0], x, preferred_element_type=jnp.float32)
    for j in range(1, kernel_size):
        xj = pltpu.roll(x, tm - j, axis=1)           # xj[:, i] == x[:, i + j]  (mod TM)
        acc = acc + jnp.dot(w_ref[j], xj, preferred_element_type=jnp.float32)
    return acc


def _stats_kernel(x_ref, w_ref, s_ref, ss_ref, *, kernel_size, n_half, tb,
                  l_cseg, l_valid, q, l_out):
    """Pass 1: per-channel sum / sum-of-squares of the conv output over valid positions."""
    y = _conv_tile(x_ref, w_ref, kernel_size)                     # (C_out, TM) f32
    tm = y.shape[-1]
    col = lax.broadcasted_iota(jnp.int32, (1, tm), 1)
    d = col % l_cseg                                              # column inside segment
    valid = d < l_valid
    if q > 1:
        # Chunked layout: also drop the last chunk's columns beyond the true L_out
        # (those read real halo data and would otherwise double-count).
        tile_idx = pl.program_id(0) * n_half + pl.program_id(1)
        seg = tile_idx * tb + col // l_cseg
        valid = jnp.logical_and(valid, (seg % q) * l_valid + d < l_out)
    ym = jnp.where(valid, y, 0.0)

    @pl.when(pl.program_id(1) == 0)
    def _init():
        s_ref[...] = jnp.zeros_like(s_ref)
        ss_ref[...] = jnp.zeros_like(ss_ref)

    s_ref[...] += jnp.sum(ym, axis=1, keepdims=True)
    ss_ref[...] += jnp.sum(ym * y, axis=1, keepdims=True)


def _apply_kernel(scalars_ref, x_ref, w_ref, s_ref, ss_ref, g_ref, b_ref, out_ref, *,
                  kernel_size):
    """Pass 2: recompute conv tile (cheap), folded BatchNorm (one FMA) + PReLU."""
    y = _conv_tile(x_ref, w_ref, kernel_size)                     # (C_out, TM) f32
    inv_count = scalars_ref[0]
    alpha = scalars_ref[1]

    mean = (s_ref[0] + s_ref[1]) * inv_count                      # (C_out, 1)
    # NOTE: single-pass variance (E[y^2] - mean^2); fine in f32 at activation scales.
    # TODO(synk): switch to a shifted/Welford accumulation if cancellation ever bites.
    var = (ss_ref[0] + ss_ref[1]) * inv_count - mean * mean
    scale = g_ref[...] * lax.rsqrt(var + BN_EPS)
    shift = b_ref[...] - mean * scale

    z = y * scale + shift
    out_ref[...] = jnp.where(z >= 0, z, alpha * z)


@functools.partial(jax.jit, static_argnames=("kernel_size",))
def conv_block_forward(x, weight, bias, gamma, beta, alpha, *, kernel_size):
    """x: (N, C_in, L) float32 (PyTorch NCL).  Returns (N, C_out, L_out)."""
    del bias  # exactly cancelled by train-mode BatchNorm's mean subtraction
    n, c_in, length = x.shape
    c_out = weight.shape[0]
    pad = kernel_size // 2
    k1 = kernel_size - 1
    l_out = length + 2 * pad - kernel_size + 1
    l_pad = length + 2 * pad

    # ---- segment / tile geometry ------------------------------------------------------
    # Flat layout: the position axis (lanes) is a run of equal-width segments; every
    # segment is self-contained (its valid outputs never read past its own end), so the
    # in-kernel roll's wrap-around only touches masked / discarded columns.
    per_col_bytes = 4 * (2 * c_in + 2 * c_out                 # double-buffered in/out
                         + kernel_size * c_in + 3 * c_out)    # in-kernel intermediates
    max_cols = max(128, (_TILE_BUDGET_BYTES // per_col_bytes) // 128 * 128)

    l_cseg = _round_up(l_pad, 8)
    tb_min = 128 // math.gcd(l_cseg, 128)      # segments/tile needed for 128-lane tiles
    if tb_min * l_cseg <= max_cols:
        q, l_valid = 1, l_out                  # one segment per sequence
    else:
        # Length-chunking shrink path: fixed 128-aligned chunk width with K-1 halo so
        # arbitrarily long sequences stay inside the VMEM budget (v7x: 64 MiB physical).
        l_cseg = (max_cols // 128) * 128
        l_valid = l_cseg - k1
        q = -(-l_out // l_valid)
        tb_min = 1

    seg_total = n * q
    tb = tb_min
    while (2 * tb * l_cseg <= max_cols) and (4 * tb <= _round_up(seg_total, 2 * tb_min)):
        tb *= 2
    tm = tb * l_cseg                           # lane-tile width (multiple of 128)
    seg_pad = _round_up(seg_total, 2 * tb)     # even number of tiles (2-core pass 1)
    n_tiles = seg_pad // tb
    n_half = n_tiles // 2
    m_flat = seg_pad * l_cseg

    # ---- plain-JAX glue: lane-dense (C_in, M) flat input -------------------------------
    trail = (q - 1) * l_valid + l_cseg - (pad + length)
    xp = jnp.pad(x.astype(jnp.float32), ((0, 0), (0, 0), (pad, trail)))
    if q == 1:
        segs = xp[:, None]                                         # (N, 1, C_in, l_cseg)
    else:
        segs = jnp.stack(
            [xp[:, :, c * l_valid:c * l_valid + l_cseg] for c in range(q)],
            axis=1)                                                # (N, q, C_in, l_cseg)
    xf = jnp.transpose(segs, (2, 0, 1, 3)).reshape(c_in, seg_total * l_cseg)
    xf = jnp.pad(xf, ((0, 0), (0, m_flat - seg_total * l_cseg)))   # zero segments

    w_taps = jnp.transpose(weight.astype(jnp.float32), (2, 0, 1))  # (K, C_out, C_in)
    g_col = gamma.astype(jnp.float32).reshape(c_out, 1)
    b_col = beta.astype(jnp.float32).reshape(c_out, 1)

    count = n * l_out
    scalars = jnp.concatenate([
        jnp.full((1,), 1.0 / count, jnp.float32),
        alpha.astype(jnp.float32).reshape(1),    # PReLU num_parameters=1 (shared alpha)
    ])

    matmul_flops = 2 * kernel_size * c_in * c_out * m_flat

    # ---- pass 1: per-channel sum / sum-of-squares (one partial per TensorCore) ---------
    stats_kernel = functools.partial(
        _stats_kernel, kernel_size=kernel_size, n_half=n_half, tb=tb,
        l_cseg=l_cseg, l_valid=l_valid, q=q, l_out=l_out)
    s_part, ss_part = pl.pallas_call(
        stats_kernel,
        out_shape=(jax.ShapeDtypeStruct((2, c_out, 1), jnp.float32),
                   jax.ShapeDtypeStruct((2, c_out, 1), jnp.float32)),
        grid=(2, n_half),
        in_specs=[
            pl.BlockSpec((c_in, tm), lambda c, t: (0, c * n_half + t)),
            pl.BlockSpec((kernel_size, c_out, c_in), lambda c, t: (0, 0, 0)),
        ],
        out_specs=(pl.BlockSpec((None, c_out, 1), lambda c, t: (c, 0, 0)),
                   pl.BlockSpec((None, c_out, 1), lambda c, t: (c, 0, 0))),
        compiler_params=pltpu.CompilerParams(
            dimension_semantics=("parallel", "arbitrary"),
            vmem_limit_bytes=_VMEM_LIMIT_BYTES),
        cost_estimate=pl.CostEstimate(
            flops=matmul_flops, transcendentals=0,
            bytes_accessed=4 * (c_in * m_flat + kernel_size * c_in * c_out + 4 * c_out)),
    )(xf, w_taps)

    # ---- pass 2: recompute conv, folded BN + PReLU, lane-dense output ------------------
    out_flat = pl.pallas_call(
        functools.partial(_apply_kernel, kernel_size=kernel_size),
        out_shape=jax.ShapeDtypeStruct((c_out, m_flat), jnp.float32),
        grid=(n_tiles,),
        in_specs=[
            pl.BlockSpec(memory_space=pltpu.MemorySpace.SMEM),      # (1/count, alpha)
            pl.BlockSpec((c_in, tm), lambda t: (0, t)),
            pl.BlockSpec((kernel_size, c_out, c_in), lambda t: (0, 0, 0)),
            pl.BlockSpec((2, c_out, 1), lambda t: (0, 0, 0)),
            pl.BlockSpec((2, c_out, 1), lambda t: (0, 0, 0)),
            pl.BlockSpec((c_out, 1), lambda t: (0, 0)),
            pl.BlockSpec((c_out, 1), lambda t: (0, 0)),
        ],
        out_specs=pl.BlockSpec((c_out, tm), lambda t: (0, t)),
        compiler_params=pltpu.CompilerParams(
            dimension_semantics=("parallel",),
            vmem_limit_bytes=_VMEM_LIMIT_BYTES),
        cost_estimate=pl.CostEstimate(
            flops=matmul_flops + 4 * c_out * m_flat,
            transcendentals=c_out * n_tiles,
            bytes_accessed=4 * (c_in + c_out) * m_flat),
    )(scalars, xf, w_taps, s_part, ss_part, g_col, b_col)

    # back to NCL: drop zero segments, per-segment halo columns and any overrun past L_out
    out = out_flat[:, :seg_total * l_cseg].reshape(c_out, n, q, l_cseg)
    out = out[:, :, :, :l_valid].reshape(c_out, n, q * l_valid)[:, :, :l_out]
    return jnp.transpose(out, (1, 0, 2))                            # (N, C_out, L_out)


def conv_block_reference(x, weight, bias, gamma, beta, alpha, kernel_size):
    """Pure-JAX reference (matches PyTorch ConvBlock.forward in train mode)."""
    pad = kernel_size // 2
    y = lax.conv_general_dilated(
        x, weight, window_strides=(1,), padding=[(pad, pad)],
        dimension_numbers=("NCH", "OIH", "NCH"))
    y = y + bias[None, :, None]
    mean = jnp.mean(y, axis=(0, 2), keepdims=True)
    var = jnp.mean((y - mean) ** 2, axis=(0, 2), keepdims=True)
    y = (y - mean) * lax.rsqrt(var + BN_EPS)
    y = y * gamma[None, :, None] + beta[None, :, None]
    return jnp.where(y >= 0, y, alpha[0] * y)


if __name__ == "__main__":
    # Small shapes consistent with the module.
    N, C_IN, C_OUT, L, K = 2, 4, 8, 16, 3

    key = jax.random.PRNGKey(0)
    kx, kw, kb, kg, kbe = jax.random.split(key, 5)

    x = jax.random.normal(kx, (N, C_IN, L), dtype=jnp.float32)

    # Deterministic parameter init (shapes per nn.Conv1d / nn.BatchNorm1d / nn.PReLU).
    weight = jax.random.normal(kw, (C_OUT, C_IN, K), dtype=jnp.float32) * 0.1
    bias = jax.random.normal(kb, (C_OUT,), dtype=jnp.float32) * 0.1
    gamma = 1.0 + 0.1 * jax.random.normal(kg, (C_OUT,), dtype=jnp.float32)
    beta = 0.1 * jax.random.normal(kbe, (C_OUT,), dtype=jnp.float32)
    alpha = jnp.full((1,), 0.25, dtype=jnp.float32)   # PReLU default init

    out = conv_block_forward(x, weight, bias, gamma, beta, alpha, kernel_size=K)
    out = jax.block_until_ready(out)

    ref = conv_block_reference(x, weight, bias, gamma, beta, alpha, K)
    assert out.shape == (N, C_OUT, L), out.shape
    assert jnp.allclose(out, ref, atol=1e-4, rtol=1e-4), "mismatch vs reference"

    print("KERNEL_OK")
</pallas_src>

<mosaic_0001>
module attributes {stable_mosaic.version = 11 : i64} {
  func.func @_stats_kernel(%arg0: i32, %arg1: i32, %arg2: memref<4x384xf32, #tpu.memory_space<vmem>>, %arg3: memref<3x8x4xf32, #tpu.memory_space<vmem>>, %arg4: memref<1x8x1xf32, #tpu.memory_space<vmem>>, %arg5: memref<1x8x1xf32, #tpu.memory_space<vmem>>) attributes {dimension_semantics = [#tpu.dimension_semantics<parallel>, #tpu.dimension_semantics<arbitrary>], iteration_bounds = array<i64: 2, 1>, scalar_prefetch = 0 : i64, scratch_operands = 0 : i64, tpu.core_type = #tpu.core_type<tc>, window_params = [{transform_indices = @transform_0, window_bounds = array<i64: 4, 384>}, {pipeline_mode = #tpu.pipeline_mode<synchronous>, transform_indices = @transform_1, window_bounds = array<i64: 3, 8, 4>}, {transform_indices = @transform_2, window_bounds = array<i64: 1, 8, 1>}, {transform_indices = @transform_3, window_bounds = array<i64: 1, 8, 1>}]} {
    %c0 = arith.constant 0 : index
    %c0_0 = arith.constant 0 : index
    %0 = vector.load %arg2[%c0, %c0_0] : memref<4x384xf32, #tpu.memory_space<vmem>>, vector<4x384xf32>
    %c0_1 = arith.constant 0 : index
    %c0_2 = arith.constant 0 : index
    %c0_3 = arith.constant 0 : index
    %1 = vector.load %arg3[%c0_1, %c0_2, %c0_3] : memref<3x8x4xf32, #tpu.memory_space<vmem>>, vector<1x8x4xf32>
    %2 = vector.shape_cast %1 : vector<1x8x4xf32> to vector<8x4xf32>
    %cst = arith.constant dense<0.000000e+00> : vector<8x384xf32>
    %3 = tpu.matmul %2, %0, %cst {dimension_numbers = #tpu.dot_dimension_numbers<[1], [0], [0], [1], [0, 0, 1, 1], [], []>} : vector<8x4xf32>, vector<4x384xf32>, vector<8x384xf32> -> vector<8x384xf32>
    %c383_i32 = arith.constant 383 : i32
    %4 = tpu.dynamic_rotate %0 by %c383_i32 dim 1 : vector<4x384xf32>, i32 -> vector<4x384xf32>
    %c1 = arith.constant 1 : index
    %c0_4 = arith.constant 0 : index
    %c0_5 = arith.constant 0 : index
    %5 = vector.load %arg3[%c1, %c0_4, %c0_5] : memref<3x8x4xf32, #tpu.memory_space<vmem>>, vector<1x8x4xf32>
    %6 = vector.shape_cast %5 : vector<1x8x4xf32> to vector<8x4xf32>
    %cst_6 = arith.constant dense<0.000000e+00> : vector<8x384xf32>
    %7 = tpu.matmul %6, %4, %cst_6 {dimension_numbers = #tpu.dot_dimension_numbers<[1], [0], [0], [1], [0, 0, 1, 1], [], []>} : vector<8x4xf32>, vector<4x384xf32>, vector<8x384xf32> -> vector<8x384xf32>
    %8 = arith.addf %3, %7 : vector<8x384xf32>
    %c382_i32 = arith.constant 382 : i32
    %9 = tpu.dynamic_rotate %0 by %c382_i32 dim 1 : vector<4x384xf32>, i32 -> vector<4x384xf32>
    %c2 = arith.constant 2 : index
    %c0_7 = arith.constant 0 : index
    %c0_8 = arith.constant 0 : index
    %10 = vector.load %arg3[%c2, %c0_7, %c0_8] : memref<3x8x4xf32, #tpu.memory_space<vmem>>, vector<1x8x4xf32>
    %11 = vector.shape_cast %10 : vector<1x8x4xf32> to vector<8x4xf32>
    %cst_9 = arith.constant dense<0.000000e+00> : vector<8x384xf32>
    %12 = tpu.matmul %11, %9, %cst_9 {dimension_numbers = #tpu.dot_dimension_numbers<[1], [0], [0], [1], [0, 0, 1, 1], [], []>} : vector<8x4xf32>, vector<4x384xf32>, vector<8x384xf32> -> vector<8x384xf32>
    %13 = arith.addf %8, %12 : vector<8x384xf32>
    %14 = tpu.iota {dimensions = array<i32: 1>} : vector<1x384xi32>
    %c24_i32 = arith.constant 24 : i32
    %c0_i32 = arith.constant 0 : i32
    %15 = arith.cmpi eq, %c24_i32, %c0_i32 : i32
    %c1_i32 = arith.constant 1 : i32
    %16 = arith.select %15, %c1_i32, %c24_i32 : i32
    %17 = vector.broadcast %16 : i32 to vector<1x384xi32>
    %18 = arith.remsi %14, %17 : vector<1x384xi32>
    %c0_i32_10 = arith.constant 0 : i32
    %19 = vector.broadcast %c0_i32_10 : i32 to vector<1x384xi32>
    %20 = arith.cmpi ne, %18, %19 : vector<1x384xi32>
    %c0_i32_11 = arith.constant 0 : i32
    %21 = vector.broadcast %c0_i32_11 : i32 to vector<1x384xi32>
    %22 = arith.cmpi slt, %18, %21 : vector<1x384xi32>
    %c0_i32_12 = arith.constant 0 : i32
    %23 = arith.cmpi slt, %16, %c0_i32_12 : i32
    %24 = vector.broadcast %23 : i1 to vector<1x384xi1>
    %25 = vector.broadcast %24 : vector<1x384xi1> to vector<1x384xi1>
    %26 = arith.xori %22, %25 : vector<1x384xi1>
    %27 = arith.andi %26, %20 : vector<1x384xi1>
    %28 = vector.broadcast %16 : i32 to vector<1x384xi32>
    %29 = arith.addi %18, %28 : vector<1x384xi32>
    %30 = arith.select %27, %29, %18 : vector<1x384xi1>, vector<1x384xi32>
    %c16_i32 = arith.constant 16 : i32
    %31 = vector.broadcast %c16_i32 : i32 to vector<1x384xi32>
    %32 = arith.cmpi slt, %30, %31 : vector<1x384xi32>
    %cst_13 = arith.constant 0.000000e+00 : f32
    %33 = vector.shape_cast %32 : vector<1x384xi1> to vector<1x384xi1>
    %34 = vector.broadcast %33 : vector<1x384xi1> to vector<8x384xi1>
    %35 = vector.broadcast %cst_13 : f32 to vector<8x384xf32>
    %36 = arith.select %34, %13, %35 : vector<8x384xi1>, vector<8x384xf32>
    %c0_i32_14 = arith.constant 0 : i32
    %37 = arith.cmpi eq, %arg1, %c0_i32_14 : i32
    %38 = arith.extui %37 : i1 to i32
    %c0_i32_15 = arith.constant 0 : i32
    %39 = arith.cmpi ne, %38, %c0_i32_15 : i32
    scf.if %39 {
      %cst_30 = arith.constant 0.000000e+00 : f32
      %57 = vector.broadcast %cst_30 : f32 to vector<8x1xf32>
      %c0_31 = arith.constant 0 : index
      %c0_32 = arith.constant 0 : index
      %c0_33 = arith.constant 0 : index
      %58 = vector.load %arg4[%c0_31, %c0_32, %c0_33] : memref<1x8x1xf32, #tpu.memory_space<vmem>>, vector<1x8x1xf32>
      %59 = vector.shape_cast %58 : vector<1x8x1xf32> to vector<8x1xf32>
      %60 = vector.shape_cast %57 : vector<8x1xf32> to vector<1x8x1xf32>
      tpu.vector_store %arg4[%c0_31, %c0_32, %c0_33], %60 {strides = array<i32>} : memref<1x8x1xf32, #tpu.memory_space<vmem>>, vector<1x8x1xf32>,
      %cst_34 = arith.constant 0.000000e+00 : f32
      %61 = vector.broadcast %cst_34 : f32 to vector<8x1xf32>
      %c0_35 = arith.constant 0 : index
      %c0_36 = arith.constant 0 : index
      %c0_37 = arith.constant 0 : index
      %62 = vector.load %arg5[%c0_35, %c0_36, %c0_37] : memref<1x8x1xf32, #tpu.memory_space<vmem>>, vector<1x8x1xf32>
      %63 = vector.shape_cast %62 : vector<1x8x1xf32> to vector<8x1xf32>
      %64 = vector.shape_cast %61 : vector<8x1xf32> to vector<1x8x1xf32>
      tpu.vector_store %arg5[%c0_35, %c0_36, %c0_37], %64 {strides = array<i32>} : memref<1x8x1xf32, #tpu.memory_space<vmem>>, vector<1x8x1xf32>,
    } else {
    }
    %c0_16 = arith.constant 0 : index
    %c0_17 = arith.constant 0 : index
    %c0_18 = arith.constant 0 : index
    %40 = vector.load %arg4[%c0_16, %c0_17, %c0_18] : memref<1x8x1xf32, #tpu.memory_space<vmem>>, vector<1x8x1xf32>
    %41 = vector.shape_cast %40 : vector<1x8x1xf32> to vector<8x1xf32>
    %cst_19 = arith.constant dense<0.000000e+00> : vector<8xf32>
    %42 = vector.multi_reduction <add>, %36, %cst_19 [1] : vector<8x384xf32> to vector<8xf32>
    %43 = vector.shape_cast %42 : vector<8xf32> to vector<8x1xf32>
    %44 = arith.addf %41, %43 : vector<8x1xf32>
    %c0_20 = arith.constant 0 : index
    %c0_21 = arith.constant 0 : index
    %c0_22 = arith.constant 0 : index
    %45 = vector.load %arg4[%c0_20, %c0_21, %c0_22] : memref<1x8x1xf32, #tpu.memory_space<vmem>>, vector<1x8x1xf32>
    %46 = vector.shape_cast %45 : vector<1x8x1xf32> to vector<8x1xf32>
    %47 = vector.shape_cast %44 : vector<8x1xf32> to vector<1x8x1xf32>
    tpu.vector_store %arg4[%c0_20, %c0_21, %c0_22], %47 {strides = array<i32>} : memref<1x8x1xf32, #tpu.memory_space<vmem>>, vector<1x8x1xf32>,
    %c0_23 = arith.constant 0 : index
    %c0_24 = arith.constant 0 : index
    %c0_25 = arith.constant 0 : index
    %48 = vector.load %arg5[%c0_23, %c0_24, %c0_25] : memref<1x8x1xf32, #tpu.memory_space<vmem>>, vector<1x8x1xf32>
    %49 = vector.shape_cast %48 : vector<1x8x1xf32> to vector<8x1xf32>
    %50 = arith.mulf %36, %13 : vector<8x384xf32>
    %cst_26 = arith.constant dense<0.000000e+00> : vector<8xf32>
    %51 = vector.multi_reduction <add>, %50, %cst_26 [1] : vector<8x384xf32> to vector<8xf32>
    %52 = vector.shape_cast %51 : vector<8xf32> to vector<8x1xf32>
    %53 = arith.addf %49, %52 : vector<8x1xf32>
    %c0_27 = arith.constant 0 : index
    %c0_28 = arith.constant 0 : index
    %c0_29 = arith.constant 0 : index
    %54 = vector.load %arg5[%c0_27, %c0_28, %c0_29] : memref<1x8x1xf32, #tpu.memory_space<vmem>>, vector<1x8x1xf32>
    %55 = vector.shape_cast %54 : vector<1x8x1xf32> to vector<8x1xf32>
    %56 = vector.shape_cast %53 : vector<8x1xf32> to vector<1x8x1xf32>
    tpu.vector_store %arg5[%c0_27, %c0_28, %c0_29], %56 {strides = array<i32>} : memref<1x8x1xf32, #tpu.memory_space<vmem>>, vector<1x8x1xf32>,
    return
  }
  func.func @transform_0(%arg0: i32, %arg1: i32) -> (i32, i32) {
    %c1_i32 = arith.constant 1 : i32
    %0 = arith.muli %arg0, %c1_i32 : i32
    %1 = arith.addi %0, %arg1 : i32
    %c0_i32 = arith.constant 0 : i32
    %c0_i32_0 = arith.constant 0 : i32
    return %c0_i32, %1 : i32, i32
  }
  func.func @transform_1(%arg0: i32, %arg1: i32) -> (i32, i32, i32) {
    %c0_i32 = arith.constant 0 : i32
    %c0_i32_0 = arith.constant 0 : i32
    %c0_i32_1 = arith.constant 0 : i32
    %c0_i32_2 = arith.constant 0 : i32
    return %c0_i32, %c0_i32_0, %c0_i32_1 : i32, i32, i32
  }
  func.func @transform_2(%arg0: i32, %arg1: i32) -> (i32, i32, i32) {
    %c0_i32 = arith.constant 0 : i32
    %c0_i32_0 = arith.constant 0 : i32
    %c0_i32_1 = arith.constant 0 : i32
    return %arg0, %c0_i32, %c0_i32_0 : i32, i32, i32
  }
  func.func @transform_3(%arg0: i32, %arg1: i32) -> (i32, i32, i32) {
    %c0_i32 = arith.constant 0 : i32
    %c0_i32_0 = arith.constant 0 : i32
    %c0_i32_1 = arith.constant 0 : i32
    return %arg0, %c0_i32, %c0_i32_0 : i32, i32, i32
  }
}

module attributes {stable_mosaic.version = 11 : i64} {
  func.func @_apply_kernel(%arg0: i32, %arg1: memref<2xf32, #tpu.memory_space<smem>>, %arg2: memref<4x384xf32, #tpu.memory_space<vmem>>, %arg3: memref<3x8x4xf32, #tpu.memory_space<vmem>>, %arg4: memref<2x8x1xf32, #tpu.memory_space<vmem>>, %arg5: memref<2x8x1xf32, #tpu.memory_space<vmem>>, %arg6: memref<8x1xf32, #tpu.memory_space<vmem>>, %arg7: memref<8x1xf32, #tpu.memory_space<vmem>>, %arg8: memref<8x384xf32, #tpu.memory_space<vmem>>) attributes {dimension_semantics = [#tpu.dimension_semantics<parallel>], iteration_bounds = array<i64: 2>, scalar_prefetch = 0 : i64, scratch_operands = 0 : i64, tpu.core_type = #tpu.core_type<tc>, window_params = [{transform_indices = @transform_0, window_bounds = array<i64: 2>}, {transform_indices = @transform_1, window_bounds = array<i64: 4, 384>}, {pipeline_mode = #tpu.pipeline_mode<synchronous>, transform_indices = @transform_2, window_bounds = array<i64: 3, 8, 4>}, {pipeline_mode = #tpu.pipeline_mode<synchronous>, transform_indices = @transform_3, window_bounds = array<i64: 2, 8, 1>}, {pipeline_mode = #tpu.pipeline_mode<synchronous>, transform_indices = @transform_4, window_bounds = array<i64: 2, 8, 1>}, {pipeline_mode = #tpu.pipeline_mode<synchronous>, transform_indices = @transform_5, window_bounds = array<i64: 8, 1>}, {pipeline_mode = #tpu.pipeline_mode<synchronous>, transform_indices = @transform_6, window_bounds = array<i64: 8, 1>}, {transform_indices = @transform_7, window_bounds = array<i64: 8, 384>}]} {
    %c0 = arith.constant 0 : index
    %c0_0 = arith.constant 0 : index
    %0 = vector.load %arg2[%c0, %c0_0] : memref<4x384xf32, #tpu.memory_space<vmem>>, vector<4x384xf32>
    %c0_1 = arith.constant 0 : index
    %c0_2 = arith.constant 0 : index
    %c0_3 = arith.constant 0 : index
    %1 = vector.load %arg3[%c0_1, %c0_2, %c0_3] : memref<3x8x4xf32, #tpu.memory_space<vmem>>, vector<1x8x4xf32>
    %2 = vector.shape_cast %1 : vector<1x8x4xf32> to vector<8x4xf32>
    %cst = arith.constant dense<0.000000e+00> : vector<8x384xf32>
    %3 = tpu.matmul %2, %0, %cst {dimension_numbers = #tpu.dot_dimension_numbers<[1], [0], [0], [1], [0, 0, 1, 1], [], []>} : vector<8x4xf32>, vector<4x384xf32>, vector<8x384xf32> -> vector<8x384xf32>
    %c383_i32 = arith.constant 383 : i32
    %4 = tpu.dynamic_rotate %0 by %c383_i32 dim 1 : vector<4x384xf32>, i32 -> vector<4x384xf32>
    %c1 = arith.constant 1 : index
    %c0_4 = arith.constant 0 : index
    %c0_5 = arith.constant 0 : index
    %5 = vector.load %arg3[%c1, %c0_4, %c0_5] : memref<3x8x4xf32, #tpu.memory_space<vmem>>, vector<1x8x4xf32>
    %6 = vector.shape_cast %5 : vector<1x8x4xf32> to vector<8x4xf32>
    %cst_6 = arith.constant dense<0.000000e+00> : vector<8x384xf32>
    %7 = tpu.matmul %6, %4, %cst_6 {dimension_numbers = #tpu.dot_dimension_numbers<[1], [0], [0], [1], [0, 0, 1, 1], [], []>} : vector<8x4xf32>, vector<4x384xf32>, vector<8x384xf32> -> vector<8x384xf32>
    %8 = arith.addf %3, %7 : vector<8x384xf32>
    %c382_i32 = arith.constant 382 : i32
    %9 = tpu.dynamic_rotate %0 by %c382_i32 dim 1 : vector<4x384xf32>, i32 -> vector<4x384xf32>
    %c2 = arith.constant 2 : index
    %c0_7 = arith.constant 0 : index
    %c0_8 = arith.constant 0 : index
    %10 = vector.load %arg3[%c2, %c0_7, %c0_8] : memref<3x8x4xf32, #tpu.memory_space<vmem>>, vector<1x8x4xf32>
    %11 = vector.shape_cast %10 : vector<1x8x4xf32> to vector<8x4xf32>
    %cst_9 = arith.constant dense<0.000000e+00> : vector<8x384xf32>
    %12 = tpu.matmul %11, %9, %cst_9 {dimension_numbers = #tpu.dot_dimension_numbers<[1], [0], [0], [1], [0, 0, 1, 1], [], []>} : vector<8x4xf32>, vector<4x384xf32>, vector<8x384xf32> -> vector<8x384xf32>
    %13 = arith.addf %8, %12 : vector<8x384xf32>
    %c0_10 = arith.constant 0 : index
    %14 = memref.load %arg1[%c0_10] : memref<2xf32, #tpu.memory_space<smem>>
    %c1_11 = arith.constant 1 : index
    %15 = memref.load %arg1[%c1_11] : memref<2xf32, #tpu.memory_space<smem>>
    %c0_12 = arith.constant 0 : index
    %c0_13 = arith.constant 0 : index
    %c0_14 = arith.constant 0 : index
    %16 = vector.load %arg4[%c0_12, %c0_13, %c0_14] : memref<2x8x1xf32, #tpu.memory_space<vmem>>, vector<1x8x1xf32>
    %17 = vector.shape_cast %16 : vector<1x8x1xf32> to vector<8x1xf32>
    %c1_15 = arith.constant 1 : index
    %c0_16 = arith.constant 0 : index
    %c0_17 = arith.constant 0 : index
    %18 = vector.load %arg4[%c1_15, %c0_16, %c0_17] : memref<2x8x1xf32, #tpu.memory_space<vmem>>, vector<1x8x1xf32>
    %19 = vector.shape_cast %18 : vector<1x8x1xf32> to vector<8x1xf32>
    %20 = arith.addf %17, %19 : vector<8x1xf32>
    %21 = vector.broadcast %14 : f32 to vector<8x1xf32>
    %22 = arith.mulf %20, %21 : vector<8x1xf32>
    %c0_18 = arith.constant 0 : index
    %c0_19 = arith.constant 0 : index
    %c0_20 = arith.constant 0 : index
    %23 = vector.load %arg5[%c0_18, %c0_19, %c0_20] : memref<2x8x1xf32, #tpu.memory_space<vmem>>, vector<1x8x1xf32>
    %24 = vector.shape_cast %23 : vector<1x8x1xf32> to vector<8x1xf32>
    %c1_21 = arith.constant 1 : index
    %c0_22 = arith.constant 0 : index
    %c0_23 = arith.constant 0 : index
    %25 = vector.load %arg5[%c1_21, %c0_22, %c0_23] : memref<2x8x1xf32, #tpu.memory_space<vmem>>, vector<1x8x1xf32>
    %26 = vector.shape_cast %25 : vector<1x8x1xf32> to vector<8x1xf32>
    %27 = arith.addf %24, %26 : vector<8x1xf32>
    %28 = vector.broadcast %14 : f32 to vector<8x1xf32>
    %29 = arith.mulf %27, %28 : vector<8x1xf32>
    %30 = arith.mulf %22, %22 : vector<8x1xf32>
    %31 = arith.subf %29, %30 : vector<8x1xf32>
    %c0_24 = arith.constant 0 : index
    %c0_25 = arith.constant 0 : index
    %32 = vector.load %arg6[%c0_24, %c0_25] : memref<8x1xf32, #tpu.memory_space<vmem>>, vector<8x1xf32>
    %cst_26 = arith.constant 9.99999974E-6 : f32
    %33 = vector.broadcast %cst_26 : f32 to vector<8x1xf32>
    %34 = arith.addf %31, %33 : vector<8x1xf32>
    %35 = math.rsqrt %34 : vector<8x1xf32>
    %36 = arith.mulf %32, %35 : vector<8x1xf32>
    %c0_27 = arith.constant 0 : index
    %c0_28 = arith.constant 0 : index
    %37 = vector.load %arg7[%c0_27, %c0_28] : memref<8x1xf32, #tpu.memory_space<vmem>>, vector<8x1xf32>
    %38 = arith.mulf %22, %36 : vector<8x1xf32>
    %39 = arith.subf %37, %38 : vector<8x1xf32>
    %40 = vector.broadcast %36 : vector<8x1xf32> to vector<8x384xf32>
    %41 = arith.mulf %13, %40 : vector<8x384xf32>
    %42 = vector.broadcast %39 : vector<8x1xf32> to vector<8x384xf32>
    %43 = arith.addf %41, %42 : vector<8x384xf32>
    %cst_29 = arith.constant 0.000000e+00 : f32
    %44 = vector.broadcast %cst_29 : f32 to vector<8x384xf32>
    %45 = arith.cmpf oge, %43, %44 : vector<8x384xf32>
    %46 = vector.broadcast %15 : f32 to vector<8x384xf32>
    %47 = arith.mulf %46, %43 : vector<8x384xf32>
    %48 = arith.select %45, %43, %47 : vector<8x384xi1>, vector<8x384xf32>
    %c0_30 = arith.constant 0 : index
    %c0_31 = arith.constant 0 : index
    %49 = vector.load %arg8[%c0_30, %c0_31] : memref<8x384xf32, #tpu.memory_space<vmem>>, vector<8x384xf32>
    tpu.vector_store %arg8[%c0_30, %c0_31], %48 {strides = array<i32>} : memref<8x384xf32, #tpu.memory_space<vmem>>, vector<8x384xf32>,
    return
  }
  func.func @transform_0(%arg0: i32) -> i32 {
    %c0_i32 = arith.constant 0 : i32
    %c0_i32_0 = arith.constant 0 : i32
    return %c0_i32 : i32
  }
  func.func @transform_1(%arg0: i32) -> (i32, i32) {
    %c0_i32 = arith.constant 0 : i32
    %c0_i32_0 = arith.constant 0 : i32
    return %c0_i32, %arg0 : i32, i32
  }
  func.func @transform_2(%arg0: i32) -> (i32, i32, i32) {
    %c0_i32 = arith.constant 0 : i32
    %c0_i32_0 = arith.constant 0 : i32
    %c0_i32_1 = arith.constant 0 : i32
    %c0_i32_2 = arith.constant 0 : i32
    return %c0_i32, %c0_i32_0, %c0_i32_1 : i32, i32, i32
  }
  func.func @transform_3(%arg0: i32) -> (i32, i32, i32) {
    %c0_i32 = arith.constant 0 : i32
    %c0_i32_0 = arith.constant 0 : i32
    %c0_i32_1 = arith.constant 0 : i32
    %c0_i32_2 = arith.constant 0 : i32
    return %c0_i32, %c0_i32_0, %c0_i32_1 : i32, i32, i32
  }
  func.func @transform_4(%arg0: i32) -> (i32, i32, i32) {
    %c0_i32 = arith.constant 0 : i32
    %c0_i32_0 = arith.constant 0 : i32
    %c0_i32_1 = arith.constant 0 : i32
    %c0_i32_2 = arith.constant 0 : i32
    return %c0_i32, %c0_i32_0, %c0_i32_1 : i32, i32, i32
  }
  func.func @transform_5(%arg0: i32) -> (i32, i32) {
    %c0_i32 = arith.constant 0 : i32
    %c0_i32_0 = arith.constant 0 : i32
    %c0_i32_1 = arith.constant 0 : i32
    return %c0_i32, %c0_i32_0 : i32, i32
  }
  func.func @transform_6(%arg0: i32) -> (i32, i32) {
    %c0_i32 = arith.constant 0 : i32
    %c0_i32_0 = arith.constant 0 : i32
    %c0_i32_1 = arith.constant 0 : i32
    return %c0_i32, %c0_i32_0 : i32, i32
  }
  func.func @transform_7(%arg0: i32) -> (i32, i32) {
    %c0_i32 = arith.constant 0 : i32
    %c0_i32_0 = arith.constant 0 : i32
    return %c0_i32, %arg0 : i32, i32
  }
}

</mosaic_0001>

<bundles_post_ra>
// kernel: conv_block_forward.2
= control target key start
LH: loop header
LB: loop body
LE: loop exit
PB: predicated region body
PF: predicated region fallthrough
CT: control target
= control target key end

     0   :  { %s1013_s12 = smov 0   ;;  %s1015_s13 = smov 0   ;;  %s1123_s0 = inlined_call_operand.vmem [shape: f32[4,768], index: 0, kind: input, shape index: {}]   ;;  %s1124_s1 = inlined_call_operand.vmem [shape: f32[3,8,4], index: 1, kind: input, shape index: {}]   ;;  %s1125_s2 = inlined_call_operand.vmem [shape: f32[2,8,1], index: 2, kind: output, shape index: {0}]   ;;  %s1126_s3 = inlined_call_operand.vmem [shape: f32[2,8,1], index: 3, kind: output, shape index: {1}]  }
   0x1   :  { %s1017_s14 = smov 0  }
   0x2 LB: > { %s26_s15 = sadd.s32 1, %s983_s13  ;;  %p878_p0 = scmp.ge.s32.totalorder %s987_s14, 1  ;;  %s987_s14 = sphi %s1017_s14, %s14_s14   ;;  %s983_s13 = sphi %s1015_s13, %s1128_s13   ;;  %s979_s12 = sphi %s1013_s12, %s1127_s12  }
   0x3   : > { %p28_p1 = scmp.ge.s32.totalorder %s26_s15, 2  ;;  %p157_p2 = scmp.lt.s32.totalorder %s987_s14, 3 }
   0x5   : > { %s1130_s15 = smov (%p28_p1, %s26_s15), 0  ;;  %p158_p3 = pnand %p878_p0, %p157_p2 }
   0x6   : > { %s186_s16 = smul.u32 (!%p158_p3), 3, %s979_s12  ;;  %v989_v0 = vmov (!%p158_p3), 0.0   ;;  %vm990_vm0 = vmmov (!%p158_p3), 0   ;;  %s991_s21 = smov (!%p158_p3), 127   ;;  %v214_v4 = vlaneseq (!%p158_p3)  ;;  %vm226_vm2 = vcmask (!%p158_p3), 1043456   ;;  %v882_v9 = vld [vmem:[%s1124_s1 + $0x8] sm:$0xff] (!%p158_p3) }
   0x7   : > { %161 = sbr.rel (%p158_p3) target bundleno = 523 (0x20b), region = 28  ;;  %907 = vmatprep.subr.mxu1 (!%p158_p3), %v989_v0  ;;  %300 = vmatprep.mubr.f32.mxu0 (!%p158_p3), %v989_v0  ;;  %s992_s22 = smov (!%p158_p3), 126   ;;  %vm222_vm3 = vcmask (!%p158_p3), 31744   ;;  %v203_v17 = vld [vmem:[%s1124_s1] sm:$0xff] (!%p158_p3)  ;;  %v893_v20 = vld [vmem:[%s1124_s1 + $0x10] sm:$0xff] (!%p158_p3)  ;;  %vm761_vm5 = vcmask (!%p158_p3), 7168  }
   0x8   : > { %p187_p4 = scmp.lt.s32.totalorder (!%p158_p3), %s186_s16, 5  ;;  %909 = vmatprep.mubr.msk.f32.mxu1 (!%p158_p3), %vm990_vm0, %v989_v0  ;;  %v215_v5 = vand.u32 (!%p158_p3), 127, %v214_v4  ;;  %p193_p5 = scmp.lt.s32.totalorder (!%p158_p3), %s979_s12, 1 }
   0xa   : > { %vm216_vm1 = vcmp.lt.s32.totalorder (!%p158_p3), %v215_v5, 127  ;;  %vm533_vm4 = vcmp.lt.s32.totalorder (!%p158_p3), %v215_v5, 126  ;;  %v696_v21 = vadd.s32 (!%p158_p3), 256, %v215_v5  ;;  %v695_v22 = vadd.s32 (!%p158_p3), 128, %v215_v5 }
   0xb   : > { %v1094_v25 = vmul.u32.u64.low (!%p158_p3), 2863311531, %v215_v5  ;;  %v1095_v26 = vmul.u32.u64.high 2863311531, %v215_v5, %v1094_v25 }
   0xc   : > { %v1091_v23 = vmul.u32.u64.low (!%p158_p3), 2863311531, %v696_v21  ;;  %v1092_v24 = vmul.u32.u64.high 2863311531, %v696_v21, %v1091_v23  ;;  %v1097_v27 = vmul.u32.u64.low (!%p158_p3), 2863311531, %v695_v22  ;;  %v1098_v28 = vmul.u32.u64.high 2863311531, %v695_v22, %v1097_v27 }
   0xd   : > { %v703_v30 = vshrl.u32 (!%p158_p3), %v1095_v26, 4 }
   0xe   : > { %s1132_s16 = smov (!%p187_p4, %s186_s16), 5  ;;  %s1134_s12 = smov (!%p193_p5, %s979_s12), 1  ;;  %v725_v29 = vshrl.u32 %v1092_v24, 4  ;;  %v714_v31 = vshrl.u32 %v1098_v28, 4 }
   0xf   : > { %s879_s17 = sshll.u32 %s1132_s16, 2  ;;  %s880_s29 = sshll.u32 %s1134_s12, 3  ;;  %v704_v33 = vmul.u32 24, %v703_v30 }
  0x10   : > { %s190_s20 = scalar_lea.vmem %s1123_s0, %s879_s17  ;;  %s1086_s5 = scalar_lea.vmem %s1125_s2, %s880_s29  ;;  %v726_v32 = vmul.u32 24, %v725_v29  ;;  %v715_v34 = vmul.u32 24, %v714_v31 }
  0x11   : > { %v201_v1 = vld [vmem:[%s190_s20] sm:$0xff]  ;;  %v202_v3 = vld [vmem:[%s190_s20 + $0x8] sm:$0xf]  ;;  %762 = vst.msk [vmem:[%s1086_s5] sm:$0xff] %vm761_vm5, %v989_v0  ;;  %v705_v36 = vsub.s32 %v215_v5, %v704_v33  ;;  %s200_s8 = scalar_lea.vmem %s1126_s3, %s880_s29 }
  0x12   : > { %208 = vrot.lane.b32.xlu1 %v201_v1, %s991_s21  ;;  %v206_v2 = vcombine.high %v201_v1, %v201_v1  ;;  %v727_v35 = vsub.s32 %v696_v21, %v726_v32  ;;  %v716_v37 = vsub.s32 %v695_v22, %v715_v34  ;;  %763 = vst.msk [vmem:[%s200_s8] sm:$0xff] %vm761_vm5, %v989_v0 }
  0x13   : > { %vm730_vm8 = vcmp.ne.s32.totalorder %v705_v36, 0  ;;  %vm733_vm9 = vcmp.lt.s32.totalorder %v705_v36, 0  ;;  %v739_v38 = vadd.s32 24, %v705_v36 }
  0x14   : > { %210 = vrot.lane.b32.xlu0 %v206_v2, %s991_s21  ;;  %vm732_vm6 = vcmp.ne.s32.totalorder %v727_v35, 0  ;;  %vm735_vm7 = vcmp.lt.s32.totalorder %v727_v35, 0  ;;  %vm731_vm10 = vcmp.ne.s32.totalorder %v716_v37, 0  ;;  %vm734_vm11 = vcmp.lt.s32.totalorder %v716_v37, 0  ;;  %vm736_vm13 = vmand %vm733_vm9, %vm730_vm8 }
  0x15   : > { %vm738_vm12 = vmand %vm735_vm7, %vm732_vm6  ;;  %v741_v39 = vadd.s32 24, %v727_v35  ;;  %v740_v40 = vadd.s32 24, %v716_v37  ;;  %v742_v41 = vsel %vm736_vm13, %v739_v38, %v705_v36 }
  0x16   : > { %529 = vrot.lane.b32.xlu1 %v206_v2, %s992_s22  ;;  %vm737_vm14 = vmand %vm734_vm11, %vm731_vm10  ;;  %vm745_vm15 = vcmp.lt.s32.totalorder %v742_v41, 16 }
  0x17   : > { %v744_v42 = vsel %vm738_vm12, %v741_v39, %v727_v35  ;;  %v743_v43 = vsel %vm737_vm14, %v740_v40, %v716_v37 }
  0x18   : > { %212 = vrot.lane.b32.xlu0 %v202_v3, %s991_s21  ;;  %v764_v58 = vld [vmem:[%s1086_s5] sm:$0xff] }
  0x19   : > { %v772_v60 = vld [vmem:[%s200_s8] sm:$0xff] }
  0x1a   : > { %527 = vrot.lane.b32.xlu1 %v201_v1, %s992_s22 }
  0x1c   : > { %531 = vrot.lane.b32.xlu0 %v202_v3, %s992_s22 }
  0x84   : > { %v209_v7 = vpop.permute.xlu1 %208 }
  0x86   : > { %v211_v6 = vpop.permute.xlu0 %210 }
  0x87   : > { %v218_v13 = vsel %vm216_vm1, %v209_v7, %v211_v6 }
  0x88   : > { %v530_v12 = vpop.permute.xlu1 %529 }
  0x8a   : > { %v213_v8 = vpop.permute.xlu0 %212 }
  0x8b   : > { %v217_v10 = vsel %vm216_vm1, %v211_v6, %v213_v8  ;;  %v219_v11 = vsel %vm216_vm1, %v213_v8, %v209_v7  ;;  %vm746_vm1 = vcmp.lt.s32.totalorder %v743_v43, 16 }
  0x8c   : > { %883 = vmatprep.subr.msk.mxu0 %vm226_vm2, %v217_v10  ;;  %908 = vmatpush3.msk.msra.mxu1 %vm226_vm2, %v219_v11  ;;  %v528_v16 = vpop.permute.xlu1 %527 }
  0x8d   : > { %884 = vmatpush1.msk.msra.mxu0 %vm226_vm2, %v218_v13  ;;  %910 = vmatmul.mubr.msk.f32.vlgmr.msra.gmra.mrb[0].mxu1 %vm222_vm3, %v882_v9  ;;  %v535_v19 = vsel %vm533_vm4, %v528_v16, %v530_v12 }
  0x8e   : > { %885 = vmatmul.mubr.msk.f32.vlgmr.msra.gmra.mrb[0].mxu0 %vm222_vm3, %v882_v9  ;;  %888 = vmatprep.subr.msk.mxu0 %vm226_vm2, %v206_v2  ;;  %v532_v14 = vpop.permute.xlu0 %531 }
  0x8f   : > { %889 = vmatpush1.msk.msra.mxu0 %vm226_vm2, %v201_v1  ;;  %912 = vmatprep.subr.mxu1 %v989_v0  ;;  %v534_v15 = vsel %vm533_vm4, %v530_v12, %v532_v14  ;;  %v536_v18 = vsel %vm533_vm4, %v532_v14, %v528_v16 }
  0x90   : > { %913 = vmatpush3.msk.msra.mxu1 %vm226_vm2, %v202_v3  ;;  %894 = vmatprep.subr.msk.mxu0 %vm226_vm2, %v534_v15 }
  0x91   : > { %914 = vmatprep.mubr.msk.f32.mxu1 %vm990_vm0, %v989_v0  ;;  %450 = vmatprep.mubr.f32.mxu0 %v989_v0 }
  0x92   : > { %917 = vmatprep.subr.mxu1 %v989_v0 }
  0x95   : > { %915 = vmatmul.mubr.msk.f32.vlgmr.msra.gmra.mrb[0].mxu1 %vm222_vm3, %v203_v17 }
  0x96   : > { %890 = vmatmul.mubr.msk.f32.vlgmr.msra.gmra.mrb[0].mxu0 %vm222_vm3, %v203_v17  ;;  %918 = vmatpush3.msk.msra.mxu1 %vm226_vm2, %v536_v18 }
  0x97   : > { %895 = vmatpush1.msk.msra.mxu0 %vm226_vm2, %v535_v19  ;;  %919 = vmatprep.mubr.msk.f32.mxu1 %vm990_vm0, %v989_v0  ;;  %vm747_vm0 = vcmp.lt.s32.totalorder %v744_v42, 16 }
  0x98   : > { %615 = vmatprep.mubr.f32.mxu0 %v989_v0 }
  0x9d   : > { %920 = vmatmul.mubr.msk.f32.vlgmr.msra.gmra.mrb[0].mxu1 %vm222_vm3, %v893_v20 }
  0x9e   : > { %896 = vmatmul.mubr.msk.f32.vlgmr.msra.gmra.mrb[0].mxu0 %vm222_vm3, %v893_v20 }
 0x170   : > { %v688_v44 = vpop.f32.mrb[0].mxu1 }
 0x171   : > { %v617_v45 = vpop.f32.mrb[0].mxu0  ;;  %v921_v46 = vpop.f32.mrb[1].mxu1  ;;  %v756_v49 = vsel %vm747_vm0, %v688_v44, 0.0 }
 0x172   : > { %v754_v47 = vsel %vm745_vm15, %v617_v45, 0.0  ;;  %v619_v48 = vpop.f32.mrb[1].mxu0  ;;  %v775_v54 = vmul.f32 %v756_v49, %v688_v44 }
 0x173   : > { %v773_v50 = vmul.f32 %v754_v47, %v617_v45  ;;  %v755_v51 = vsel %vm746_vm1, %v619_v48, 0.0 }
 0x174   : > { %v765_v52 = vadd.f32 %v755_v51, %v754_v47  ;;  %v774_v53 = vmul.f32 %v755_v51, %v619_v48 }
 0x176   : > { %v776_v55 = vadd.f32 %v774_v53, %v773_v50  ;;  %v766_v56 = vadd.f32 %v765_v52, %v756_v49 }
 0x178   : > { %767 = vadd.xlane.f32.xlu0 %v766_v56  ;;  %v777_v57 = vadd.f32 %v776_v55, %v775_v54 }
 0x17a   : > { %778 = vadd.xlane.f32.xlu1 %v777_v57 }
 0x205   : > { %v768_v59 = vpop.xlane.xlu0 %767 }
 0x206   : > { %v769_v61 = vadd.f32 %v768_v59, %v764_v58 }
 0x207   : > { %v779_v62 = vpop.xlane.xlu1 %778 }
 0x208   : > { %771 = vst.msk [vmem:[%s1086_s5] sm:$0xff] %vm761_vm5, %v769_v61  ;;  %v780_v63 = vadd.f32 %v779_v62, %v772_v60 }
 0x20a   : > { %781 = vst.msk [vmem:[%s200_s8] sm:$0xff] %vm761_vm5, %v780_v63 }
 0x20b PF: > { %s14_s14 = sadd.s32 1, %s987_s14   ;;  %s1127_s12 = smov %s983_s13 }
 0x20c   : > { %p11_p6 = scmp.ge.s32.totalorder %s14_s14, 4   ;;  %s1128_s13 = smov %s1130_s15 }
 0x20e   :  { %13 = sbr.rel (!%p11_p6) target bundleno = 2 (0x2), region = 76 }

// kernel: conv_block_forward.3
= control target key start
LH: loop header
LB: loop body
LE: loop exit
PB: predicated region body
PF: predicated region fallthrough
CT: control target
= control target key end

     0   :  { %12 = vsyncpa [#allocation3], 0  ;;  %s1071_s24 = smov 0   ;;  %s1170_s0 = inlined_call_operand.vmem [shape: f32[2], index: 0, kind: input, shape index: {}]   ;;  %s1171_s1 = inlined_call_operand.vmem [shape: f32[4,768], index: 1, kind: input, shape index: {}]   ;;  %s1172_s2 = inlined_call_operand.vmem [shape: f32[3,8,4], index: 2, kind: input, shape index: {}]   ;;  %s1173_s3 = inlined_call_operand.vmem [shape: f32[2,8,1], index: 3, kind: input, shape index: {}]   ;;  %s1174_s4 = inlined_call_operand.vmem [shape: f32[2,8,1], index: 4, kind: input, shape index: {}]   ;;  %s1175_s5 = inlined_call_operand.vmem [shape: f32[8,1], index: 5, kind: input, shape index: {}]   ;;  %s1176_s6 = inlined_call_operand.vmem [shape: f32[8,1], index: 6, kind: input, shape index: {}]   ;;  %s1177_s7 = inlined_call_operand.vmem [shape: f32[8,768], index: 7, kind: output, shape index: {}]  }
   0x1 LB: > { %s909_s25 = sadd.s32 4294967295, %s1023_s24   ;;  %p911_p0 = scmp.ge.s32.totalorder %s1023_s24, 1  ;;  %s1023_s24 = sphi %s1071_s24, %s18_s24  }
   0x2   : > { %p201_p1 = scmp.lt.s32.totalorder %s1023_s24, 3  ;;  %s214_s28 = sshll.u32 %s1170_s0, 4  ;;  %s215_s28 = int_to_ptr.vmem [resolvable:$true] %s214_s28 }
   0x3   : > { %p1086_p3 = scmp.eq.s32.totalorder %s909_s25, 0  ;;  %s998_s8 = scalar_lea.vmem %s215_s28, 16 }
   0x4   : > { %p1082_p2 = pnand %p911_p0, %p201_p1  ;;  %p999_p6 = scmp.ne.s32.totalorder %s215_s28, %s998_s8 }
   0x5   : > { %p1006_p10 = scmp.lt.s32.totalorder %s215_s28, %s215_s28  ;;  %p1007_p11 = scmp.lt.s32.totalorder %s998_s8, %s998_s8 }
   0x6   : > { %p973_p4 = pneg %p1082_p2 }
   0x7   : > { %p1008_p12 = por %p1007_p11, %p1006_p10 }
   0x8   : > { %p974_p5 = pnand %p1086_p3, %p973_p4 }
   0xa   : > { %p1000_p7 = pneg %p974_p5 }
   0xc   : > { %p1001_p8 = pnand %p1000_p7, %p999_p6 }
   0xe   : > { %p1002_p9 = pneg %p1001_p8 }
  0x10   : > { %p1009_p13 = pnand %p1008_p12, %p1002_p9 }
  0x12   : > { %1012 = shalt.err (!%p1009_p13)
}
  0x13   : > { %s1025_s9 = smov [#allocation2]   ;;  %251 = sbr.rel (%p1082_p2) target bundleno = 398 (0x18e), region = 48 }
  0x14   : > { %976 = dma.vmem_to_smem (!%p974_p5), %s215_s28, 16, %s1025_s9, [#allocation3]  }
  0x1a   : > { %1018 = dma.done.wait (%p1086_p3), [#allocation3], 16  }
  0x1b   : > { %1020 = vsyncadd (%p1086_p3), [#allocation3], 4294967280 }
  0x1c   : > { %257 = sfence }
  0x1d   : > { %s284_s10 = smul.u32 3, %s909_s25  ;;  %v1026_v0 = vmov 0.0   ;;  %vm1027_vm0 = vmmov 0   ;;  %s1028_s15 = smov 127   ;;  %v792_v4 = vld [vmem:[%s1173_s3] sm:$0xff]  ;;  %v936_v5 = vld [vmem:[%s1173_s3 + $0x8] sm:$0xff]  ;;  %v309_v23 = vlaneseq }
  0x1e   : > { %946 = vmatprep.subr.mxu1 %v1026_v0  ;;  %395 = vmatprep.mubr.f32.mxu0 %v1026_v0  ;;  %s1029_s16 = smov 126   ;;  %s790_s17 = sld [smem:[#allocation2]]  ;;  %v798_v6 = vld [vmem:[%s1174_s4] sm:$0xff]  ;;  %v1030_v7 = vmov 0   ;;  %v937_v8 = vld [vmem:[%s1174_s4 + $0x8] sm:$0xff]  ;;  %v795_v9 = vadd.f32 %v936_v5, %v792_v4  ;;  %vm321_vm2 = vcmask 1043456  }
  0x1f   : > { %p285_p0 = scmp.lt.s32.totalorder %s284_s10, 5  ;;  %948 = vmatprep.mubr.msk.f32.mxu1 %vm1027_vm0, %v1026_v0  ;;  %993 = vset.pattern.permute.xlu0 %v1030_v7  ;;  %v801_v10 = vadd.f32 %v937_v8, %v798_v6  ;;  %v805_v17 = vld [vmem:[%s1175_s5] sm:$0xff]  ;;  %v310_v24 = vand.u32 127, %v309_v23  ;;  %v918_v28 = vld [vmem:[%s1172_s2 + $0x8] sm:$0xff]  ;;  %vm317_vm3 = vcmask 31744   ;;  %v929_v39 = vld [vmem:[%s1172_s2 + $0x10] sm:$0xff] }
  0x20   : > { %994 = vset.pattern.permute.xlu1 %v1030_v7  ;;  %v809_v20 = vld [vmem:[%s1176_s6] sm:$0xff] }
  0x21   : > { %s1181_s10 = smov (!%p285_p0, %s284_s10), 5  ;;  %vm311_vm1 = vcmp.lt.s32.totalorder %v310_v24, 127  ;;  %vm628_vm4 = vcmp.lt.s32.totalorder %v310_v24, 126  ;;  %v298_v36 = vld [vmem:[%s1172_s2] sm:$0xff] }
  0x22   : > { %s916_s11 = sshll.u32 %s1181_s10, 2 }
  0x23   : > { %s288_s14 = scalar_lea.vmem %s1171_s1, %s916_s11 }
  0x24   : > { %v296_v1 = vld [vmem:[%s288_s14] sm:$0xff]  ;;  %v297_v3 = vld [vmem:[%s288_s14 + $0x8] sm:$0xf]  ;;  %v796_v11 = vstv %s790_s17 }
  0x25   : > { %303 = vrot.lane.b32.xlu1 %v296_v1, %s1028_s15  ;;  %v301_v2 = vcombine.high %v296_v1, %v296_v1  ;;  %v797_v12 = vmul.f32 %v796_v11, %v795_v9  ;;  %v802_v13 = vmul.f32 %v801_v10, %v796_v11 }
  0x27   : > { %305 = vrot.lane.b32.xlu0 %v301_v2, %s1028_s15  ;;  %v803_v14 = vmul.f32 %v797_v12, %v797_v12 }
  0x29   : > { %624 = vrot.lane.b32.xlu1 %v301_v2, %s1029_s16  ;;  %v804_v15 = vsub.f32 %v802_v13, %v803_v14 }
  0x2b   : > { %307 = vrot.lane.b32.xlu0 %v297_v3, %s1028_s15  ;;  %v806_v16 = vadd.f32 1e-05, %v804_v15  ;;  %s935_s15 = sld [smem:[#allocation2 + $0x1]] }
  0x2d   : > { %622 = vrot.lane.b32.xlu1 %v296_v1, %s1029_s16  ;;  %996 = vrsqrt.f32 %v806_v16 }
  0x2f   : > { %626 = vrot.lane.b32.xlu0 %v297_v3, %s1029_s16  ;;  %s917_s16 = sshll.u32 %s1181_s10, 3 }
  0x30   : > { %s294_s19 = scalar_lea.vmem %s1177_s7, %s917_s16 }
  0x31   : > { %v831_v47 = vstv %s935_s15 }
  0x37   : > { %v997_v18 = vpop.eup %996 }
  0x38   : > { %v808_v19 = vmul.f32 %v997_v18, %v805_v17 }
  0x3a   : > { %814 = vperm.xlu0 %993, %v808_v19   ;;  %v810_v21 = vmul.f32 %v808_v19, %v797_v12 }
  0x3c   : > { %v811_v22 = vsub.f32 %v809_v20, %v810_v21 }
  0x3e   : > { %822 = vperm.xlu1 %994, %v811_v22  }
  0x97   : > { %v304_v26 = vpop.permute.xlu1 %303 }
  0x99   : > { %v306_v25 = vpop.permute.xlu0 %305 }
  0x9a   : > { %v313_v32 = vsel %vm311_vm1, %v304_v26, %v306_v25 }
  0x9b   : > { %v625_v31 = vpop.permute.xlu1 %624 }
  0x9d   : > { %v308_v27 = vpop.permute.xlu0 %307 }
  0x9e   : > { %v312_v29 = vsel %vm311_vm1, %v306_v25, %v308_v27  ;;  %v314_v30 = vsel %vm311_vm1, %v308_v27, %v304_v26 }
  0x9f   : > { %919 = vmatprep.subr.msk.mxu0 %vm321_vm2, %v312_v29  ;;  %947 = vmatpush3.msk.msra.mxu1 %vm321_vm2, %v314_v30  ;;  %v623_v35 = vpop.permute.xlu1 %622 }
  0xa0   : > { %920 = vmatpush1.msk.msra.mxu0 %vm321_vm2, %v313_v32  ;;  %949 = vmatmul.mubr.msk.f32.vlgmr.msra.gmra.mrb[0].mxu1 %vm317_vm3, %v918_v28  ;;  %v630_v38 = vsel %vm628_vm4, %v623_v35, %v625_v31 }
  0xa1   : > { %921 = vmatmul.mubr.msk.f32.vlgmr.msra.gmra.mrb[0].mxu0 %vm317_vm3, %v918_v28  ;;  %924 = vmatprep.subr.msk.mxu0 %vm321_vm2, %v301_v2  ;;  %v627_v33 = vpop.permute.xlu0 %626 }
  0xa2   : > { %925 = vmatpush1.msk.msra.mxu0 %vm321_vm2, %v296_v1  ;;  %951 = vmatprep.subr.mxu1 %v1026_v0  ;;  %v629_v34 = vsel %vm628_vm4, %v625_v31, %v627_v33  ;;  %v631_v37 = vsel %vm628_vm4, %v627_v33, %v623_v35 }
  0xa3   : > { %952 = vmatpush3.msk.msra.mxu1 %vm321_vm2, %v297_v3  ;;  %930 = vmatprep.subr.msk.mxu0 %vm321_vm2, %v629_v34 }
  0xa4   : > { %953 = vmatprep.mubr.msk.f32.mxu1 %vm1027_vm0, %v1026_v0  ;;  %545 = vmatprep.mubr.f32.mxu0 %v1026_v0 }
  0xa5   : > { %956 = vmatprep.subr.mxu1 %v1026_v0 }
  0xa8   : > { %954 = vmatmul.mubr.msk.f32.vlgmr.msra.gmra.mrb[0].mxu1 %vm317_vm3, %v298_v36 }
  0xa9   : > { %926 = vmatmul.mubr.msk.f32.vlgmr.msra.gmra.mrb[0].mxu0 %vm317_vm3, %v298_v36  ;;  %957 = vmatpush3.msk.msra.mxu1 %vm321_vm2, %v631_v37 }
  0xaa   : > { %931 = vmatpush1.msk.msra.mxu0 %vm321_vm2, %v630_v38  ;;  %958 = vmatprep.mubr.msk.f32.mxu1 %vm1027_vm0, %v1026_v0 }
  0xab   : > { %710 = vmatprep.mubr.f32.mxu0 %v1026_v0 }
  0xb0   : > { %959 = vmatmul.mubr.msk.f32.vlgmr.msra.gmra.mrb[0].mxu1 %vm317_vm3, %v929_v39 }
  0xb1   : > { %932 = vmatmul.mubr.msk.f32.vlgmr.msra.gmra.mrb[0].mxu0 %vm317_vm3, %v929_v39 }
  0xb9   : > { %v815_v40 = vpop.permute.xlu0 %814 }
  0xbd   : > { %v823_v42 = vpop.permute.xlu1 %822 }
 0x183   : > { %v783_v41 = vpop.f32.mrb[0].mxu1 }
 0x184   : > { %v819_v43 = vmul.f32 %v815_v40, %v783_v41  ;;  %v712_v44 = vpop.f32.mrb[0].mxu0  ;;  %v960_v45 = vpop.f32.mrb[1].mxu1 }
 0x185   : > { %v817_v46 = vmul.f32 %v815_v40, %v712_v44  ;;  %v714_v48 = vpop.f32.mrb[1].mxu0 }
 0x186   : > { %v827_v49 = vadd.f32 %v823_v42, %v819_v43  ;;  %v818_v50 = vmul.f32 %v815_v40, %v714_v48 }
 0x187   : > { %v825_v51 = vadd.f32 %v823_v42, %v817_v46 }
 0x188   : > { %vm830_vm5 = vcmp.ge.f32.partialorder %v827_v49, 0.0  ;;  %v834_v52 = vmul.f32 %v831_v47, %v827_v49  ;;  %v826_v53 = vadd.f32 %v823_v42, %v818_v50 }
 0x189   : > { %vm828_vm6 = vcmp.ge.f32.partialorder %v825_v51, 0.0  ;;  %v832_v54 = vmul.f32 %v831_v47, %v825_v51 }
 0x18a   : > { %v837_v55 = vsel %vm830_vm5, %v827_v49, %v834_v52  ;;  %vm829_vm7 = vcmp.ge.f32.partialorder %v826_v53, 0.0  ;;  %v833_v56 = vmul.f32 %v831_v47, %v826_v53 }
 0x18b   : > { %v835_v57 = vsel %vm828_vm6, %v825_v51, %v832_v54  ;;  %840 = vst [vmem:[%s294_s19 + $0x10] sm:$0xff] %v837_v55 }
 0x18c   : > { %838 = vst [vmem:[%s294_s19] sm:$0xff] %v835_v57  ;;  %v836_v58 = vsel %vm829_vm7, %v826_v53, %v833_v56 }
 0x18d   : > { %839 = vst [vmem:[%s294_s19 + $0x8] sm:$0xff] %v836_v58 }
 0x18e PF: > { %s18_s24 = sadd.s32 1, %s1023_s24  }
 0x18f   : > { %p15_p1 = scmp.ge.s32.totalorder %s18_s24, 4  }
 0x191   :  { %17 = sbr.rel (!%p15_p1) target bundleno = 1 (0x1), region = 87 }
 0x198   :  { %863 = vsyncpa [#allocation3], 1 }
 0x199   :  { %865 = vsyncpa [#allocation3 + $0x1], 1 }

</bundles_post_ra>
